<compile_context>
chip_gen: v7x
topology: tpu7x:2x2x1
jax: 0.10.0
libtpu: 0.0.40
codegen_flags: <defaults>
</compile_context>

<pallas_src>
import functools
import math

import jax
import jax.numpy as jnp
from jax.experimental import pallas as pl
from jax.experimental.pallas import tpu as pltpu

LANE = 128
SUBLANE = 8
NEG_SLOPE = 0.2


def _round_up(n: int, m: int) -> int:
    return ((n + m - 1) // m) * m


def _fused_mlp_kernel(x_ref, *refs, n_layers: int, compute_dtype):
    """Whole MLP for one row-tile: Linear -> LeakyReLU(0.2) -> ... -> Linear.

    refs = (w_0, b_0, ..., w_{L-1}, b_{L-1}, o_ref).
    Hidden feature dims are padded to 128 lanes (padded rows/cols are exactly
    zero, so they never perturb real outputs); the input K and final
    out_features keep their true widths.  Matmuls run in bf16 on the MXU with
    f32 accumulation; bias + LeakyReLU in f32; inter-layer carry in bf16.
    """
    o_ref = refs[-1]
    h = x_ref[...].astype(compute_dtype)                    # [tile_m, K]
    for i in range(n_layers):
        w = refs[2 * i][...]                                # [in_i, out_i] compute_dtype
        b = refs[2 * i + 1][...]                            # [1, out_i]    f32
        y = jnp.dot(h, w, preferred_element_type=jnp.float32) + b
        if i < n_layers - 1:
            y = jnp.maximum(y, NEG_SLOPE * y)                # LeakyReLU(0.2), f32 VPU
            h = y.astype(compute_dtype)                      # bf16 carry: half the spill
        else:
            h = y
    o_ref[...] = h.astype(o_ref.dtype)


def init_mlp_params(key, sizes, *, dtype=jnp.float32, compute_dtype=jnp.bfloat16):
    """torch.nn.Linear-style init (uniform +-1/sqrt(fan_in)).

    Weights stored as [in, out] (transpose of PyTorch's [out, in]) in
    `compute_dtype`; biases as [1, out] in f32.  Only the *hidden* dims are
    padded to 128 lanes (padding is exactly zero); the layer-0 input dim and
    the last-layer output dim keep their true sizes.  Unpadded f32 masters are
    kept for reference checking only.
    """
    n_layers = len(sizes) - 1
    weights, biases, weights_f32, biases_f32 = [], [], [], []
    for i in range(n_layers):
        fan_in, fan_out = sizes[i], sizes[i + 1]
        key, kw, kb = jax.random.split(key, 3)
        bound = 1.0 / math.sqrt(fan_in)
        w = jax.random.uniform(kw, (fan_in, fan_out), dtype, -bound, bound)
        b = jax.random.uniform(kb, (1, fan_out), dtype, -bound, bound)
        in_pad = fan_in if i == 0 else _round_up(fan_in, LANE)
        out_pad = fan_out if i == n_layers - 1 else _round_up(fan_out, LANE)
        w_pad = jnp.zeros((in_pad, out_pad), compute_dtype).at[:fan_in, :fan_out].set(
            w.astype(compute_dtype))
        b_pad = jnp.zeros((1, out_pad), jnp.float32).at[:, :fan_out].set(
            b.astype(jnp.float32))
        weights.append(w_pad)
        biases.append(b_pad)
        weights_f32.append(w)
        biases_f32.append(b)
    return {
        "weights": weights, "biases": biases,
        "weights_f32": weights_f32, "biases_f32": biases_f32,
        "sizes": tuple(sizes), "compute_dtype": compute_dtype,
    }


def mlp_forward(x, params, *, block_m: int = 1024):
    """Fused MLP forward: x [M, in_features] -> [M, out_features]."""
    weights, biases = params["weights"], params["biases"]
    sizes = params["sizes"]
    n_layers = len(weights)
    M, K = x.shape
    assert K == sizes[0]
    out_features = sizes[-1]
    out_dtype = x.dtype

    # Row tiling: >= 2 grid steps whenever M > 8 so the "parallel" axis can shard
    # across v7x's two TensorCores; up to block_m rows to amortize step overhead.
    tile_m = min(block_m, _round_up(max(pl.cdiv(M, 2), 1), SUBLANE))
    M_pad = _round_up(M, tile_m)
    grid = (M_pad // tile_m,)

    # Only rows are padded; K keeps its true width (no host pad pass over K).
    x_p = x if M_pad == M else jnp.pad(x, ((0, M_pad - M), (0, 0)))

    in_specs = [pl.BlockSpec((tile_m, K), lambda i: (i, 0))]
    flat_params = []
    for w, b in zip(weights, biases):
        # Constant index_map -> weights/biases stay VMEM-resident across grid steps.
        # TODO(synk): for hidden dims >= ~2048 add pipeline_mode=pl.Buffered(1) on
        # these (constant-index blocks don't need double buffers) or a K grid axis
        # with an f32 accumulator so resident weights fit v7x's 64 MiB VMEM.
        in_specs.append(pl.BlockSpec(w.shape, lambda i: (0, 0)))
        in_specs.append(pl.BlockSpec(b.shape, lambda i: (0, 0)))
        flat_params += [w, b]

    # Honest cost estimate from the true (unpadded) problem size.
    flops = 2 * M * sum(sizes[i] * sizes[i + 1] for i in range(n_layers))
    param_bytes = sum(int(p.size) * p.dtype.itemsize for p in flat_params)
    bytes_accessed = (M * K * x.dtype.itemsize + param_bytes
                      + M * out_features * jnp.dtype(out_dtype).itemsize)

    # Explicit VMEM budget: double-buffered x/out tiles + resident params +
    # headroom for spilled f32 intermediates; clamped well under v7x's 64 MiB.
    max_width = max(int(w.shape[1]) for w in weights)
    vmem_need = (2 * tile_m * (K * x.dtype.itemsize
                               + out_features * jnp.dtype(out_dtype).itemsize)
                 + param_bytes + 4 * tile_m * max_width * 4)
    vmem_limit = int(min(max(2 * vmem_need, 16 * 1024 * 1024), 56 * 1024 * 1024))

    kernel = functools.partial(_fused_mlp_kernel, n_layers=n_layers,
                               compute_dtype=params["compute_dtype"])

    out_p = pl.pallas_call(
        kernel,
        out_shape=jax.ShapeDtypeStruct((M_pad, out_features), out_dtype),
        grid=grid,
        in_specs=in_specs,
        out_specs=pl.BlockSpec((tile_m, out_features), lambda i: (i, 0)),
        compiler_params=pltpu.CompilerParams(
            dimension_semantics=("parallel",),
            vmem_limit_bytes=vmem_limit),
        cost_estimate=pl.CostEstimate(
            flops=flops, transcendentals=0, bytes_accessed=bytes_accessed),
    )(x_p, *flat_params)

    return out_p if M_pad == M else out_p[:M]


# TODO(synk): batchnorm=True / dropout=True variants of the PyTorch module are not
# exercised by the default constructor and are not implemented here.


if __name__ == "__main__":
    sizes = (32, 64, 48, 16)   # MLP(32, 64, 48, 16)
    batch = 20                 # exercises both row padding and a >1-step grid

    key = jax.random.PRNGKey(0)
    kx, kp = jax.random.split(key)
    x = jax.random.normal(kx, (batch, sizes[0]), jnp.float32)
    params = init_mlp_params(kp, sizes)

    out = mlp_forward(x, params)
    out = jax.block_until_ready(out)
    assert out.shape == (batch, sizes[-1])

    # Reference 1: exact replica of the kernel math (bf16 matmul, f32 accum,
    # bf16 inter-layer carry) in plain JAX -- should match tightly.
    cdt = params["compute_dtype"]
    h = x.astype(cdt)
    for i, (w, b) in enumerate(zip(params["weights"], params["biases"])):
        y = jnp.dot(h, w, preferred_element_type=jnp.float32) + b
        if i < len(params["weights"]) - 1:
            y = jnp.maximum(y, NEG_SLOPE * y)
            h = y.astype(cdt)
        else:
            h = y
    ref_bf16 = h
    assert jnp.allclose(out, ref_bf16, atol=1e-4, rtol=1e-4), "mismatch vs bf16 reference"

    # Reference 2: full-f32 PyTorch-equivalent math (loose tolerance: the kernel
    # intentionally runs its matmuls in bf16 with f32 accumulation).
    ref = x
    for i, (w, b) in enumerate(zip(params["weights_f32"], params["biases_f32"])):
        ref = ref @ w + b
        if i < len(params["weights_f32"]) - 1:
            ref = jnp.where(ref >= 0, ref, NEG_SLOPE * ref)
    assert jnp.allclose(out, ref, atol=5e-2, rtol=5e-2), "mismatch vs f32 reference"

    print("KERNEL_OK")
</pallas_src>

<mosaic_0001>
module attributes {stable_mosaic.version = 11 : i64} {
  func.func @_fused_mlp_kernel(%arg0: i32, %arg1: memref<16x32xf32, #tpu.memory_space<vmem>>, %arg2: memref<32x128xbf16, #tpu.memory_space<vmem>>, %arg3: memref<1x128xf32, #tpu.memory_space<vmem>>, %arg4: memref<128x128xbf16, #tpu.memory_space<vmem>>, %arg5: memref<1x128xf32, #tpu.memory_space<vmem>>, %arg6: memref<128x16xbf16, #tpu.memory_space<vmem>>, %arg7: memref<1x16xf32, #tpu.memory_space<vmem>>, %arg8: memref<16x16xf32, #tpu.memory_space<vmem>>) attributes {dimension_semantics = [#tpu.dimension_semantics<parallel>], iteration_bounds = array<i64: 2>, scalar_prefetch = 0 : i64, scratch_operands = 0 : i64, tpu.core_type = #tpu.core_type<tc>, window_params = [{transform_indices = @transform_0, window_bounds = array<i64: 16, 32>}, {pipeline_mode = #tpu.pipeline_mode<synchronous>, transform_indices = @transform_1, window_bounds = array<i64: 32, 128>}, {pipeline_mode = #tpu.pipeline_mode<synchronous>, transform_indices = @transform_2, window_bounds = array<i64: 1, 128>}, {pipeline_mode = #tpu.pipeline_mode<synchronous>, transform_indices = @transform_3, window_bounds = array<i64: 128, 128>}, {pipeline_mode = #tpu.pipeline_mode<synchronous>, transform_indices = @transform_4, window_bounds = array<i64: 1, 128>}, {pipeline_mode = #tpu.pipeline_mode<synchronous>, transform_indices = @transform_5, window_bounds = array<i64: 128, 16>}, {pipeline_mode = #tpu.pipeline_mode<synchronous>, transform_indices = @transform_6, window_bounds = array<i64: 1, 16>}, {transform_indices = @transform_7, window_bounds = array<i64: 16, 16>}]} {
    %c0 = arith.constant 0 : index
    %c0_0 = arith.constant 0 : index
    %0 = vector.load %arg1[%c0, %c0_0] : memref<16x32xf32, #tpu.memory_space<vmem>>, vector<16x32xf32>
    %1 = arith.truncf %0 : vector<16x32xf32> to vector<16x32xbf16>
    %c0_1 = arith.constant 0 : index
    %c0_2 = arith.constant 0 : index
    %2 = vector.load %arg2[%c0_1, %c0_2] : memref<32x128xbf16, #tpu.memory_space<vmem>>, vector<32x128xbf16>
    %c0_3 = arith.constant 0 : index
    %c0_4 = arith.constant 0 : index
    %3 = vector.load %arg3[%c0_3, %c0_4] : memref<1x128xf32, #tpu.memory_space<vmem>>, vector<1x128xf32>
    %cst = arith.constant dense<0.000000e+00> : vector<16x128xf32>
    %4 = tpu.matmul %1, %2, %cst {dimension_numbers = #tpu.dot_dimension_numbers<[1], [0], [0], [1], [0, 0, 1, 1], [], []>} : vector<16x32xbf16>, vector<32x128xbf16>, vector<16x128xf32> -> vector<16x128xf32>
    %5 = vector.broadcast %3 : vector<1x128xf32> to vector<16x128xf32>
    %6 = arith.addf %4, %5 : vector<16x128xf32>
    %cst_5 = arith.constant 2.000000e-01 : f32
    %7 = vector.broadcast %cst_5 : f32 to vector<16x128xf32>
    %8 = arith.mulf %7, %6 : vector<16x128xf32>
    %9 = arith.maximumf %6, %8 : vector<16x128xf32>
    %10 = arith.truncf %9 : vector<16x128xf32> to vector<16x128xbf16>
    %c0_6 = arith.constant 0 : index
    %c0_7 = arith.constant 0 : index
    %11 = vector.load %arg4[%c0_6, %c0_7] : memref<128x128xbf16, #tpu.memory_space<vmem>>, vector<128x128xbf16>
    %c0_8 = arith.constant 0 : index
    %c0_9 = arith.constant 0 : index
    %12 = vector.load %arg5[%c0_8, %c0_9] : memref<1x128xf32, #tpu.memory_space<vmem>>, vector<1x128xf32>
    %cst_10 = arith.constant dense<0.000000e+00> : vector<16x128xf32>
    %13 = tpu.matmul %10, %11, %cst_10 {dimension_numbers = #tpu.dot_dimension_numbers<[1], [0], [0], [1], [0, 0, 1, 1], [], []>} : vector<16x128xbf16>, vector<128x128xbf16>, vector<16x128xf32> -> vector<16x128xf32>
    %14 = vector.broadcast %12 : vector<1x128xf32> to vector<16x128xf32>
    %15 = arith.addf %13, %14 : vector<16x128xf32>
    %cst_11 = arith.constant 2.000000e-01 : f32
    %16 = vector.broadcast %cst_11 : f32 to vector<16x128xf32>
    %17 = arith.mulf %16, %15 : vector<16x128xf32>
    %18 = arith.maximumf %15, %17 : vector<16x128xf32>
    %19 = arith.truncf %18 : vector<16x128xf32> to vector<16x128xbf16>
    %c0_12 = arith.constant 0 : index
    %c0_13 = arith.constant 0 : index
    %20 = vector.load %arg6[%c0_12, %c0_13] : memref<128x16xbf16, #tpu.memory_space<vmem>>, vector<128x16xbf16>
    %c0_14 = arith.constant 0 : index
    %c0_15 = arith.constant 0 : index
    %21 = vector.load %arg7[%c0_14, %c0_15] : memref<1x16xf32, #tpu.memory_space<vmem>>, vector<1x16xf32>
    %cst_16 = arith.constant dense<0.000000e+00> : vector<16x16xf32>
    %22 = tpu.matmul %19, %20, %cst_16 {dimension_numbers = #tpu.dot_dimension_numbers<[1], [0], [0], [1], [0, 0, 1, 1], [], []>} : vector<16x128xbf16>, vector<128x16xbf16>, vector<16x16xf32> -> vector<16x16xf32>
    %23 = vector.broadcast %21 : vector<1x16xf32> to vector<16x16xf32>
    %24 = arith.addf %22, %23 : vector<16x16xf32>
    %c0_17 = arith.constant 0 : index
    %c0_18 = arith.constant 0 : index
    %25 = vector.load %arg8[%c0_17, %c0_18] : memref<16x16xf32, #tpu.memory_space<vmem>>, vector<16x16xf32>
    tpu.vector_store %arg8[%c0_17, %c0_18], %24 {strides = array<i32>} : memref<16x16xf32, #tpu.memory_space<vmem>>, vector<16x16xf32>,
    return
  }
  func.func @transform_0(%arg0: i32) -> (i32, i32) {
    %c0_i32 = arith.constant 0 : i32
    %c0_i32_0 = arith.constant 0 : i32
    return %arg0, %c0_i32 : i32, i32
  }
  func.func @transform_1(%arg0: i32) -> (i32, i32) {
    %c0_i32 = arith.constant 0 : i32
    %c0_i32_0 = arith.constant 0 : i32
    %c0_i32_1 = arith.constant 0 : i32
    return %c0_i32, %c0_i32_0 : i32, i32
  }
  func.func @transform_2(%arg0: i32) -> (i32, i32) {
    %c0_i32 = arith.constant 0 : i32
    %c0_i32_0 = arith.constant 0 : i32
    %c0_i32_1 = arith.constant 0 : i32
    return %c0_i32, %c0_i32_0 : i32, i32
  }
  func.func @transform_3(%arg0: i32) -> (i32, i32) {
    %c0_i32 = arith.constant 0 : i32
    %c0_i32_0 = arith.constant 0 : i32
    %c0_i32_1 = arith.constant 0 : i32
    return %c0_i32, %c0_i32_0 : i32, i32
  }
  func.func @transform_4(%arg0: i32) -> (i32, i32) {
    %c0_i32 = arith.constant 0 : i32
    %c0_i32_0 = arith.constant 0 : i32
    %c0_i32_1 = arith.constant 0 : i32
    return %c0_i32, %c0_i32_0 : i32, i32
  }
  func.func @transform_5(%arg0: i32) -> (i32, i32) {
    %c0_i32 = arith.constant 0 : i32
    %c0_i32_0 = arith.constant 0 : i32
    %c0_i32_1 = arith.constant 0 : i32
    return %c0_i32, %c0_i32_0 : i32, i32
  }
  func.func @transform_6(%arg0: i32) -> (i32, i32) {
    %c0_i32 = arith.constant 0 : i32
    %c0_i32_0 = arith.constant 0 : i32
    %c0_i32_1 = arith.constant 0 : i32
    return %c0_i32, %c0_i32_0 : i32, i32
  }
  func.func @transform_7(%arg0: i32) -> (i32, i32) {
    %c0_i32 = arith.constant 0 : i32
    %c0_i32_0 = arith.constant 0 : i32
    return %arg0, %c0_i32 : i32, i32
  }
}

</mosaic_0001>

<bundles_post_ra>
// kernel: tpu_custom_call.1
= control target key start
LH: loop header
LB: loop body
LE: loop exit
PB: predicated region body
PF: predicated region fallthrough
CT: control target
= control target key end

     0   :  { %12 = vsyncpa [#allocation3], 0  ;;  %s1148_s0 = inlined_call_operand.hbm [shape: f32[32,32], index: 0, kind: input, shape index: {}]   ;;  %s1149_s1 = inlined_call_operand.vmem [shape: bf16[32,128], index: 1, kind: input, shape index: {}]   ;;  %s1150_s2 = inlined_call_operand.vmem [shape: f32[1,128], index: 2, kind: input, shape index: {}]   ;;  %s1151_s3 = inlined_call_operand.vmem [shape: bf16[128,128], index: 3, kind: input, shape index: {}]   ;;  %s1152_s4 = inlined_call_operand.vmem [shape: f32[1,128], index: 4, kind: input, shape index: {}]   ;;  %s1153_s5 = inlined_call_operand.vmem [shape: bf16[128,16], index: 5, kind: input, shape index: {}]   ;;  %s1154_s6 = inlined_call_operand.vmem [shape: f32[1,16], index: 6, kind: input, shape index: {}]   ;;  %s1155_s7 = inlined_call_operand.vmem [shape: f32[32,16], index: 7, kind: output, shape index: {}]  }
   0x1   :  { %14 = vsyncpa [#allocation3 + $0x1], 0  ;;  %s954_s24 = smov 0   ;;  %s956_s25 = smov 0  }
   0x2   :  { %s958_s26 = smov 0   ;;  %s960_s27 = smov 0  }
   0x3 LB: > { %s677_s28 = sadd.s32 4294967295, %s907_s27   ;;  %s974_s29 = sadd.s32 1, %s907_s27   ;;  %s907_s27 = sphi %s960_s27, %s1162_s27   ;;  %s903_s26 = sphi %s958_s26, %s1161_s26   ;;  %s899_s25 = sphi %s956_s25, %s1160_s25   ;;  %s895_s24 = sphi %s954_s24, %s1159_s24  }
   0x4   : > { %s24_s30 = ssub.s32 %s907_s27, %s974_s29  ;;  %s27_s8 = sadd.s32 1, %s903_s26 }
   0x5   : > { %p25_p0 = scmp.eq.s32.totalorder %s24_s30, 0  ;;  %p34_p1 = scmp.ne.s32.totalorder %s903_s26, %s899_s25 }
   0x6   : > { %p35_p2 = scmp.eq.s32.totalorder %s907_s27, 0  ;;  %p40_p3 = scmp.ne.s32.totalorder %s899_s25, %s895_s24 }
   0x7   : > { %s984_s9 = scalar_select %p25_p0, %s903_s26, %s27_s8  }
   0x8   : > { %p36_p4 = por %p35_p2, %p34_p1  ;;  %p41_p5 = scmp.eq.s32.totalorder %s677_s28, 0 }
   0x9   : > { %p788_p6 = scmp.lt.s32.totalorder %s907_s27, 2  ;;  %s234_s11 = sand.u32 1, %s903_s26  }
   0xa   : > { %p989_p7 = por %p41_p5, %p40_p3  ;;  %s681_s12 = sshll.u32 %s234_s11, 4 }
   0xb   : > { %s712_s13 = sshll.u32 %s907_s27, 8  ;;  %s238_s17 = scalar_lea.vmem [#allocation2], %s681_s12 }
   0xc   : > { %s998_s16 = scalar_lea.hbm %s1148_s0, %s712_s13  ;;  %s245_s18 = sshll.u32 %s238_s17, 4  ;;  %s1000_s18 = int_to_ptr.vmem [resolvable:$true] %s245_s18 }
   0xd   : > { %p1002_p8 = pnand %p788_p6, %p36_p4  ;;  %s1007_s20 = scalar_lea.sflag [#allocation3], %s234_s11 }
   0xe   : > { %s843_s21 = scalar_lea.hbm %s998_s16, 256  ;;  %s848_s24 = scalar_lea.hbm %s1148_s0, 512 }
   0xf   : > { %p844_p10 = scmp.ne.s32.totalorder %s998_s16, %s843_s21  ;;  %p845_p11 = pneg %p1002_p8 }
  0x10   : > { %p849_p0 = scmp.lt.u32.totalorder %s998_s16, %s1148_s0  ;;  %p850_p1 = scmp.lt.u32.totalorder %s848_s24, %s843_s21 }
  0x11   : > { %p846_p12 = pnand %p845_p11, %p844_p10  ;;  %p852_p3 = scmp.lt.u32.totalorder %s843_s21, %s998_s16 }
  0x12   : > { %p851_p2 = por %p850_p1, %p849_p0 }
  0x13   : > { %p847_p13 = pneg %p846_p12 }
  0x14   : > { %p853_p4 = por %p852_p3, %p851_p2 }
  0x16   : > { %p854_p5 = pnand %p853_p4, %p847_p13 }
  0x18   : > { %857 = shalt.err (!%p854_p5)
}
  0x19   : > { %s858_s11 = scalar_lea.vmem %s1000_s18, 256  ;;  %s909_s12 = smov [#allocation2]  }
  0x1a   : > { %p859_p6 = scmp.ne.s32.totalorder %s1000_s18, %s858_s11  ;;  %s863_s13 = sshll.u32 %s909_s12, 4  ;;  %s864_s13 = int_to_ptr.vmem [resolvable:$false] %s863_s13 }
  0x1b   : > { %s865_s14 = scalar_lea.vmem %s864_s13, 512  ;;  %p866_p9 = scmp.lt.s32.totalorder %s1000_s18, %s864_s13 }
  0x1c   : > { %p861_p10 = pnand %p859_p6, %p845_p11  ;;  %p867_p0 = scmp.lt.s32.totalorder %s865_s14, %s858_s11 }
  0x1e   : > { %p862_p12 = pneg %p861_p10  ;;  %p868_p1 = por %p867_p0, %p866_p9 }
  0x20   : > { %p869_p2 = pnand %p868_p1, %p862_p12 }
  0x22   : > { %872 = shalt.err (!%p869_p2)
}
  0x23   : > { %s910_s15 = smov 128   ;;  %s911_s17 = smov 8  }
  0x24   : > { %787 = dma.hbm_to_vmem [thread:$0]  (!%p1002_p8), %s998_s16, 256, %s1000_s18, %s1007_s20, %s910_s15, %s910_s15, %s911_s17  }
  0x25   : > { %p253_p11 = scmp.lt.s32.totalorder %s907_s27, 3  ;;  %p1158_p13 = scmp.ge.s32.totalorder %s907_s27, 1 }
  0x27   : > { %p254_p3 = pnand %p1158_p13, %p253_p11 }
  0x28   : > { %s259_s21 = sand.u32 (!%p254_p3), 1, %s899_s25  }
  0x29   : > { %257 = sbr.rel (%p254_p3) target bundleno = 720 (0x2d0), region = 48  ;;  %s685_s22 = sshll.u32 (!%p254_p3), %s259_s21, 4 }
  0x2a   : > { %s260_s23 = scalar_lea.sflag (!%p254_p3), [#allocation3], %s259_s21  ;;  %s263_s24 = scalar_lea.vmem (!%p254_p3), [#allocation2], %s685_s22 }
  0x30   : > { %890 = dma.done.wait (%p989_p7), %s260_s23, 256  }
  0x31   : > { %892 = vsyncadd (%p989_p7), %s260_s23, 4294967040  ;;  %v912_v0 = vmov 0.0   ;;  %vm913_vm0 = vmmov 0   ;;  %v825_v1 = vld [vmem:[%s1149_s1] sm:$0xff]   ;;  %v826_v2 = vld [vmem:[%s1149_s1 + $0x8] sm:$0xff]   ;;  %vm328_vm1 = vcmask 261120  }
  0x32   : > { %734 = vmatprep.subr.bf16.mxu0 %v912_v0  ;;  %738 = vmatprep.mubr.msk.bf16.mxu0 %vm913_vm0, %v912_v0  ;;  %v302_v3 = vld [vmem:[%s263_s24] sm:$0xff]  ;;  %v303_v4 = vld [vmem:[%s263_s24 + $0x8] sm:$0xff]  ;;  %s686_s8 = sshll.u32 %s677_s28, 1  ;;  %vm607_vm2 = vcmask 130048  }
  0x33   : > { %742 = vmatprep.subr.bf16.mxu1 %v912_v0  ;;  %758 = vmatprep.mubr.msk.bf16.mxu1 %vm913_vm0, %v912_v0  ;;  %v827_v5 = vld [vmem:[%s1151_s3] sm:$0xff]   ;;  %v304_v6 = vpack.c.bf16 %v303_v4, %v302_v3  ;;  %v828_v7 = vld [vmem:[%s1151_s3 + $0x8] sm:$0xff]   ;;  %v829_v8 = vld [vmem:[%s1151_s3 + $0x10] sm:$0xff]   ;;  %p296_p7 = scmp.lt.s32.totalorder %s686_s8, 3 }
  0x34   : > { %735 = vmatpush3.bf16.msra.mxu0 %v825_v1  ;;  %743 = vmatpush3.bf16.msra.mxu1 %v827_v5  ;;  %v830_v9 = vld [vmem:[%s1151_s3 + $0x18] sm:$0xff]   ;;  %v831_v10 = vld [vmem:[%s1151_s3 + $0x20] sm:$0xff]   ;;  %v832_v11 = vld [vmem:[%s1151_s3 + $0x28] sm:$0xff]  }
  0x35   : > { %736 = vmatprep.subr.bf16.mxu0 %v912_v0  ;;  %744 = vmatprep.subr.bf16.mxu1 %v912_v0  ;;  %v833_v12 = vld [vmem:[%s1151_s3 + $0x30] sm:$0xff]   ;;  %v834_v13 = vld [vmem:[%s1151_s3 + $0x38] sm:$0xff]   ;;  %v835_v14 = vld [vmem:[%s1153_s5] sm:$0xff]   ;;  %s1164_s8 = smov (!%p296_p7, %s686_s8), 3 }
  0x36   : > { %v836_v15 = vld [vmem:[%s1153_s5 + $0x8] sm:$0xff]   ;;  %v837_v16 = vld [vmem:[%s1153_s5 + $0x10] sm:$0xff]   ;;  %v838_v17 = vld [vmem:[%s1153_s5 + $0x18] sm:$0xff]   ;;  %s687_s11 = sshll.u32 %s1164_s8, 3 }
  0x37   : > { %v839_v18 = vld [vmem:[%s1153_s5 + $0x20] sm:$0xff]   ;;  %v840_v31 = vld [vmem:[%s1153_s5 + $0x28] sm:$0xff]   ;;  %v841_v32 = vld [vmem:[%s1153_s5 + $0x30] sm:$0xff]   ;;  %s299_s17 = scalar_lea.vmem %s1155_s7, %s687_s11 }
  0x38   : > { %737 = vmatpush3.bf16.msra.mxu0 %v826_v2  ;;  %745 = vmatpush3.bf16.msra.mxu1 %v828_v7  ;;  %v688_v19 = vld [vmem:[%s1150_s2] ss:$0 sm:$0xff]  ;;  %v842_v33 = vld [vmem:[%s1153_s5 + $0x38] sm:$0xff]  }
  0x39   : > { %762 = vmatprep.subr.bf16.mxu0 %v912_v0  ;;  %746 = vmatprep.subr.bf16.mxu1 %v912_v0  ;;  %v692_v34 = vld [vmem:[%s1152_s4] ss:$0 sm:$0xff] }
  0x3a   : > { %v701_v46 = vld [vmem:[%s1154_s6] ss:$0 sm:$0xff] }
  0x3b   : > { %739 = vmatmul.mubr.msk.bf16.vlgmr.msra.gmra.mrb[0].mxu0 %vm328_vm1, %v304_v6 }
  0x3c   : > { %778 = vmatprep.mubr.msk.bf16.mxu0 %vm913_vm0, %v912_v0  ;;  %747 = vmatpush3.bf16.msra.mxu1 %v829_v8 }
  0x3d   : > { %748 = vmatprep.subr.bf16.mxu1 %v912_v0  ;;  %763 = vmatpush3.bf16.msra.mxu0 %v835_v14 }
  0x3e   : > { %764 = vmatprep.subr.bf16.mxu0 %v912_v0 }
  0x40   : > { %749 = vmatpush3.bf16.msra.mxu1 %v830_v9 }
  0x41   : > { %750 = vmatprep.subr.bf16.mxu1 %v912_v0  ;;  %765 = vmatpush3.bf16.msra.mxu0 %v836_v15 }
  0x42   : > { %766 = vmatprep.subr.bf16.mxu0 %v912_v0 }
  0x44   : > { %751 = vmatpush3.bf16.msra.mxu1 %v831_v10 }
  0x45   : > { %752 = vmatprep.subr.bf16.mxu1 %v912_v0  ;;  %767 = vmatpush3.bf16.msra.mxu0 %v837_v16 }
  0x46   : > { %768 = vmatprep.subr.bf16.mxu0 %v912_v0 }
  0x48   : > { %753 = vmatpush3.bf16.msra.mxu1 %v832_v11 }
  0x49   : > { %754 = vmatprep.subr.bf16.mxu1 %v912_v0  ;;  %769 = vmatpush3.bf16.msra.mxu0 %v838_v17 }
  0x4a   : > { %770 = vmatprep.subr.bf16.mxu0 %v912_v0 }
  0x4c   : > { %755 = vmatpush3.bf16.msra.mxu1 %v833_v12 }
  0x4d   : > { %756 = vmatprep.subr.bf16.mxu1 %v912_v0  ;;  %771 = vmatpush3.bf16.msra.mxu0 %v839_v18 }
  0x4e   : > { %772 = vmatprep.subr.bf16.mxu0 %v912_v0 }
  0x50   : > { %757 = vmatpush3.bf16.msra.mxu1 %v834_v13 }
  0x51   : > { %773 = vmatpush3.bf16.msra.mxu0 %v840_v31 }
  0x52   : > { %774 = vmatprep.subr.bf16.mxu0 %v912_v0 }
  0x55   : > { %775 = vmatpush3.bf16.msra.mxu0 %v841_v32 }
  0x56   : > { %776 = vmatprep.subr.bf16.mxu0 %v912_v0 }
  0x59   : > { %777 = vmatpush3.bf16.msra.mxu0 %v842_v33 }
 0x10e   : > { %v366_v20 = vpop.f32.mrb[0].mxu0 }
 0x10f   : > { %v367_v21 = vadd.f32 %v688_v19, %v366_v20  ;;  %v740_v22 = vpop.f32.mrb[1].mxu0 }
 0x110   : > { %v369_v23 = vpop.f32.mrb[2].mxu0 }
 0x111   : > { %v373_v24 = vmul.f32 0.2, %v367_v21  ;;  %v370_v25 = vadd.f32 %v688_v19, %v369_v23  ;;  %v741_v26 = vpop.f32.mrb[3].mxu0 }
 0x113   : > { %v374_v27 = vmul.f32 0.2, %v370_v25  ;;  %v375_v28 = vmax.f32 %v367_v21, %v373_v24 }
 0x115   : > { %v376_v29 = vmax.f32 %v370_v25, %v374_v27 }
 0x117   : > { %v377_v30 = vpack.c.bf16 %v376_v29, %v375_v28 }
 0x119   : > { %759 = vmatmul.mubr.bf16.vlgmr.msra.gmra.mrb[0].mxu1 %v377_v30 }
 0x1ec   : > { %v483_v35 = vpop.f32.mrb[0].mxu1 }
 0x1ed   : > { %v484_v36 = vadd.f32 %v692_v34, %v483_v35  ;;  %v760_v37 = vpop.f32.mrb[1].mxu1 }
 0x1ee   : > { %v486_v38 = vpop.f32.mrb[2].mxu1 }
 0x1ef   : > { %v490_v39 = vmul.f32 0.2, %v484_v36  ;;  %v487_v40 = vadd.f32 %v692_v34, %v486_v38  ;;  %v761_v41 = vpop.f32.mrb[3].mxu1 }
 0x1f1   : > { %v491_v42 = vmul.f32 0.2, %v487_v40  ;;  %v492_v43 = vmax.f32 %v484_v36, %v490_v39 }
 0x1f3   : > { %v493_v44 = vmax.f32 %v487_v40, %v491_v42 }
 0x1f5   : > { %v494_v45 = vpack.c.bf16 %v493_v44, %v492_v43 }
 0x1f7   : > { %779 = vmatmul.mubr.bf16.vlgmr.msra.gmra.mrb[4].mxu0 %v494_v45 }
 0x2ca   : > { %v600_v47 = vpop.f32.mrb[4].mxu0 }
 0x2cb   : > { %v601_v48 = vadd.f32 %v701_v46, %v600_v47  ;;  %v780_v49 = vpop.f32.mrb[5].mxu0 }
 0x2cc   : > { %v603_v50 = vpop.f32.mrb[6].mxu0 }
 0x2cd   : > { %608 = vst.msk [vmem:[%s299_s17] sm:$0xff] %vm607_vm2, %v601_v48  ;;  %v604_v51 = vadd.f32 %v701_v46, %v603_v50  ;;  %v781_v52 = vpop.f32.mrb[7].mxu0 }
 0x2cf   : > { %609 = vst.msk [vmem:[%s299_s17 + $0x8] sm:$0xff] %vm607_vm2, %v604_v51 }
 0x2d0 PF: > { %p17_p8 = scmp.ge.s32.totalorder %s974_s29, 4   ;;  %s1159_s24 = smov %s899_s25 }
 0x2d1   : > { %s1160_s25 = smov %s903_s26  ;;  %s1161_s26 = smov %s984_s9 }
 0x2d2   : > { %s1162_s27 = smov %s974_s29  ;;  %19 = sbr.rel (!%p17_p8) target bundleno = 3 (0x3), region = 88 }
 0x2d9   :  { %632 = vsyncpa [#allocation3], 1 }
 0x2da   :  { %634 = vsyncpa [#allocation3 + $0x1], 1 }

</bundles_post_ra>
